<compile_context>
chip_gen: v6e
topology: v6e:2x2x1
jax: 0.10.0
libtpu: 0.0.40
codegen_flags: <defaults>
</compile_context>

<pallas_src>
import jax
import jax.numpy as jnp
from jax import lax
from jax.experimental import pallas as pl
from jax.experimental.pallas import tpu as pltpu


def summary_embed_kernel(x_ref, p_ref, out_ref):
    # x_ref:  (S0, E)        -- already reduced to LSTM-batch row S1-1 in wrapper
    # p_ref:  (3E+8, 4E)     -- packed [wfused; whh; wlout(lane 0:E); bfused; blout]
    # out_ref:(S0, E)
    S0, E = x_ref.shape

    wfused = p_ref[0:E, :]                       # (E, 4E)  lin folded into w_ih
    whh = p_ref[E:2 * E, :]                      # (E, 4E)
    wlout = p_ref[2 * E:3 * E, 0:E]              # (E, E)
    bfused = p_ref[3 * E:3 * E + 1, :]           # (1, 4E)
    blout = p_ref[3 * E + 1:3 * E + 2, 0:E]      # (1, E)

    # Hoisted input projection for all time steps (lin + LSTM input weights fused).
    gx = jnp.dot(x_ref[...], wfused,
                 preferred_element_type=jnp.float32) + bfused        # (S0, 4E)

    # ---- t = 0 : h0 = c0 = 0 -> no recurrent matmul, no f*c term ----
    g0 = gx[0:1, :]
    sg = jax.nn.sigmoid(g0)                      # one lane-dense EUP pass
    tg = jnp.tanh(g0)                            # one lane-dense EUP pass
    c = sg[:, 0:E] * tg[:, 2 * E:3 * E]          # i * g
    h = sg[:, 3 * E:4 * E] * jnp.tanh(c)         # o * tanh(c)
    hs = [h]

    # ---- t = 1 .. S0-1 : generic unrolled step ----
    for t in range(1, S0):
        gates = gx[t:t + 1, :] + jnp.dot(h, whh,
                                         preferred_element_type=jnp.float32)  # (1,4E)
        sg = jax.nn.sigmoid(gates)
        tg = jnp.tanh(gates)
        i = sg[:, 0:E]
        f = sg[:, E:2 * E]
        o = sg[:, 3 * E:4 * E]
        g = tg[:, 2 * E:3 * E]
        c = f * c + i * g
        h = o * jnp.tanh(c)
        hs.append(h)

    hcat = jnp.concatenate(hs, axis=0) if S0 > 1 else hs[0]          # (S0, E)
    out_ref[...] = (jnp.dot(hcat, wlout,
                            preferred_element_type=jnp.float32) + blout)


def summary_embed_gen_batched(x_last, params_packed):
    """x_last: (N, S0, E) already sliced to LSTM-batch row S1-1. Returns (N, S0, E)."""
    N, S0, E = x_last.shape
    P0, P1 = params_packed.shape
    return pl.pallas_call(
        summary_embed_kernel,
        out_shape=jax.ShapeDtypeStruct((N, S0, E), jnp.float32),
        grid_spec=pltpu.PrefetchScalarGridSpec(
            num_scalar_prefetch=0,
            grid=(N,),
            in_specs=[
                # per-sequence input block; leading dim squeezed away
                pl.BlockSpec((None, S0, E), lambda n: (n, 0, 0)),
                # packed weights/biases: same block for every grid step -> stays resident
                pl.BlockSpec((P0, P1), lambda n: (0, 0)),
            ],
            out_specs=pl.BlockSpec((None, S0, E), lambda n: (n, 0, 0)),
        ),
        compiler_params=pltpu.CompilerParams(
            dimension_semantics=("parallel",)),
    )(x_last, params_packed)


def summary_embed_gen(x, params_packed):
    """Module-equivalent forward for a single X of shape (S0, S1, E)."""
    S0, S1, E = x.shape
    x_last = x[:, S1 - 1, :][None]               # wrapper-side last-row slice -> (1, S0, E)
    return summary_embed_gen_batched(x_last, params_packed)[0]


def init_params(key, emb_size):
    """Deterministic synthetic params matching nn.Linear / nn.LSTM shapes."""
    E = emb_size
    k = 1.0 / jnp.sqrt(jnp.float32(E))
    ks = jax.random.split(key, 8)
    u = lambda kk, shape: jax.random.uniform(kk, shape, jnp.float32, -k, k)

    lin_w = u(ks[0], (E, E))       # nn.Linear weight (out, in)
    lin_b = u(ks[1], (E,))
    w_ih = u(ks[2], (4 * E, E))    # nn.LSTM weight_ih_l0
    w_hh = u(ks[3], (4 * E, E))    # nn.LSTM weight_hh_l0
    b_ih = u(ks[4], (4 * E,))
    b_hh = u(ks[5], (4 * E,))
    lout_w = u(ks[6], (E, E))
    lout_b = u(ks[7], (E,))

    p = {
        "wlin": lin_w.T,                         # (E, E)  (for x @ w convention)
        "blin": lin_b.reshape(1, E),
        "wih": w_ih.T,                           # (E, 4E)
        "whh": w_hh.T,                           # (E, 4E)
        "bgate": (b_ih + b_hh).reshape(1, 4 * E),
        "wlout": lout_w.T,
        "blout": lout_b.reshape(1, E),
    }
    # Offline fusion of `lin` into the LSTM input weights:
    #   x @ wlin @ wih + blin @ wih + bgate == x @ wfused + bfused
    p["wfused"] = p["wlin"] @ p["wih"]           # (E, 4E)
    p["bfused"] = p["blin"] @ p["wih"] + p["bgate"]
    return p


def pack_params(p, emb_size):
    """Pack all kernel operands into one (3E+8, 4E) f32 array (single DMA)."""
    E = emb_size
    wpack = jnp.zeros((3 * E + 8, 4 * E), jnp.float32)
    wpack = wpack.at[0:E, :].set(p["wfused"])
    wpack = wpack.at[E:2 * E, :].set(p["whh"])
    wpack = wpack.at[2 * E:3 * E, 0:E].set(p["wlout"])
    wpack = wpack.at[3 * E, :].set(p["bfused"][0])
    wpack = wpack.at[3 * E + 1, 0:E].set(p["blout"][0])
    return wpack


def reference_forward(x, params):
    """Pure-JAX mirror of the PyTorch forward (unfused, full-batch recurrence)."""
    S0, S1, E = x.shape
    vec_in = x @ params["wlin"] + params["blin"]          # lin(X)

    def step(carry, x_t):
        h, c = carry
        gates = x_t @ params["wih"] + h @ params["whh"] + params["bgate"]
        i = jax.nn.sigmoid(gates[:, 0:E])
        f = jax.nn.sigmoid(gates[:, E:2 * E])
        g = jnp.tanh(gates[:, 2 * E:3 * E])
        o = jax.nn.sigmoid(gates[:, 3 * E:4 * E])
        c = f * c + i * g
        h = o * jnp.tanh(c)
        return (h, c), h

    h0 = jnp.zeros((S1, E), jnp.float32)
    c0 = jnp.zeros((S1, E), jnp.float32)
    _, out = lax.scan(step, (h0, c0), vec_in)             # (S0, S1, E)
    last = out[:, -1, :]                                  # (S0, E)
    return last @ params["wlout"] + params["blout"]


if __name__ == "__main__":
    emb_size = 32
    max_seq_len = 8
    S0, S1, E = 2, max_seq_len, emb_size                  # X: (2, 8, 32)
    N = 4                                                 # independent sequences (grid axis)

    key = jax.random.PRNGKey(0)
    kx, kp, kb = jax.random.split(key, 3)
    x = jax.random.normal(kx, (S0, S1, E), jnp.float32)
    params = init_params(kp, E)
    wpack = pack_params(params, E)

    # Single-X (module-equivalent) path.
    y = jax.block_until_ready(summary_embed_gen(x, wpack))
    y_ref = reference_forward(x, params)
    assert y.shape == (S0, E)
    assert jnp.allclose(y, y_ref, rtol=1e-4, atol=1e-5)

    # Batched path: N independent sequences in one pallas_call (parallel grid axis).
    xb = jax.random.normal(kb, (N, S0, S1, E), jnp.float32)
    xb_last = xb[:, :, S1 - 1, :]                         # (N, S0, E) wrapper-side slice
    yb = jax.block_until_ready(summary_embed_gen_batched(xb_last, wpack))
    assert yb.shape == (N, S0, E)
    for n in range(N):
        ref_n = reference_forward(xb[n], params)
        assert jnp.allclose(yb[n], ref_n, rtol=1e-4, atol=1e-5)

    print("KERNEL_OK")
</pallas_src>

<mosaic_0001>
module attributes {stable_mosaic.version = 11 : i64} {
  func.func @summary_embed_kernel(%arg0: i32, %arg1: memref<1x2x32xf32, #tpu.memory_space<vmem>>, %arg2: memref<104x128xf32, #tpu.memory_space<vmem>>, %arg3: memref<1x2x32xf32, #tpu.memory_space<vmem>>) attributes {dimension_semantics = [#tpu.dimension_semantics<parallel>], iteration_bounds = array<i64: 1>, scalar_prefetch = 0 : i64, scratch_operands = 0 : i64, tpu.core_type = #tpu.core_type<tc>, window_params = [{transform_indices = @transform_0, window_bounds = array<i64: 1, 2, 32>}, {pipeline_mode = #tpu.pipeline_mode<synchronous>, transform_indices = @transform_1, window_bounds = array<i64: 104, 128>}, {transform_indices = @transform_2, window_bounds = array<i64: 1, 2, 32>}]} {
    %c0 = arith.constant 0 : index
    %c0_0 = arith.constant 0 : index
    %0 = vector.load %arg2[%c0, %c0_0] : memref<104x128xf32, #tpu.memory_space<vmem>>, vector<32x128xf32>
    %c32 = arith.constant 32 : index
    %c0_1 = arith.constant 0 : index
    %1 = vector.load %arg2[%c32, %c0_1] : memref<104x128xf32, #tpu.memory_space<vmem>>, vector<32x128xf32>
    %c64 = arith.constant 64 : index
    %c0_2 = arith.constant 0 : index
    %2 = vector.load %arg2[%c64, %c0_2] : memref<104x128xf32, #tpu.memory_space<vmem>>, vector<32x32xf32>
    %c96 = arith.constant 96 : index
    %c0_3 = arith.constant 0 : index
    %3 = vector.load %arg2[%c96, %c0_3] : memref<104x128xf32, #tpu.memory_space<vmem>>, vector<1x128xf32>
    %c97 = arith.constant 97 : index
    %c0_4 = arith.constant 0 : index
    %4 = vector.load %arg2[%c97, %c0_4] : memref<104x128xf32, #tpu.memory_space<vmem>>, vector<1x32xf32>
    %c0_5 = arith.constant 0 : index
    %c0_6 = arith.constant 0 : index
    %c0_7 = arith.constant 0 : index
    %5 = vector.load %arg1[%c0_5, %c0_6, %c0_7] : memref<1x2x32xf32, #tpu.memory_space<vmem>>, vector<1x2x32xf32>
    %6 = vector.shape_cast %5 : vector<1x2x32xf32> to vector<2x32xf32>
    %cst = arith.constant dense<0.000000e+00> : vector<2x128xf32>
    %7 = tpu.matmul %6, %0, %cst {dimension_numbers = #tpu.dot_dimension_numbers<[1], [0], [0], [1], [0, 0, 1, 1], [], []>} : vector<2x32xf32>, vector<32x128xf32>, vector<2x128xf32> -> vector<2x128xf32>
    %8 = vector.broadcast %3 : vector<1x128xf32> to vector<2x128xf32>
    %9 = arith.addf %7, %8 : vector<2x128xf32>
    %10 = vector.extract_strided_slice %9 {offsets = [0, 0], sizes = [1, 128], strides = [1, 1]} : vector<2x128xf32> to vector<1x128xf32>
    %11 = arith.negf %10 : vector<1x128xf32>
    %12 = math.exp %11 : vector<1x128xf32>
    %cst_8 = arith.constant 1.000000e+00 : f32
    %13 = vector.broadcast %cst_8 : f32 to vector<1x128xf32>
    %14 = arith.addf %13, %12 : vector<1x128xf32>
    %15 = arith.divf %13, %14 : vector<1x128xf32>
    %16 = math.tanh %10 : vector<1x128xf32>
    %17 = vector.extract_strided_slice %15 {offsets = [0, 0], sizes = [1, 32], strides = [1, 1]} : vector<1x128xf32> to vector<1x32xf32>
    %18 = vector.extract_strided_slice %16 {offsets = [0, 64], sizes = [1, 32], strides = [1, 1]} : vector<1x128xf32> to vector<1x32xf32>
    %19 = arith.mulf %17, %18 : vector<1x32xf32>
    %20 = vector.extract_strided_slice %15 {offsets = [0, 96], sizes = [1, 32], strides = [1, 1]} : vector<1x128xf32> to vector<1x32xf32>
    %21 = math.tanh %19 : vector<1x32xf32>
    %22 = arith.mulf %20, %21 : vector<1x32xf32>
    %23 = vector.extract_strided_slice %9 {offsets = [1, 0], sizes = [1, 128], strides = [1, 1]} : vector<2x128xf32> to vector<1x128xf32>
    %cst_9 = arith.constant dense<0.000000e+00> : vector<1x128xf32>
    %24 = tpu.matmul %22, %1, %cst_9 {dimension_numbers = #tpu.dot_dimension_numbers<[1], [0], [0], [1], [0, 0, 1, 1], [], []>} : vector<1x32xf32>, vector<32x128xf32>, vector<1x128xf32> -> vector<1x128xf32>
    %25 = arith.addf %23, %24 : vector<1x128xf32>
    %26 = arith.negf %25 : vector<1x128xf32>
    %27 = math.exp %26 : vector<1x128xf32>
    %cst_10 = arith.constant 1.000000e+00 : f32
    %28 = vector.broadcast %cst_10 : f32 to vector<1x128xf32>
    %29 = arith.addf %28, %27 : vector<1x128xf32>
    %30 = arith.divf %28, %29 : vector<1x128xf32>
    %31 = math.tanh %25 : vector<1x128xf32>
    %32 = vector.extract_strided_slice %30 {offsets = [0, 0], sizes = [1, 32], strides = [1, 1]} : vector<1x128xf32> to vector<1x32xf32>
    %33 = vector.extract_strided_slice %30 {offsets = [0, 32], sizes = [1, 32], strides = [1, 1]} : vector<1x128xf32> to vector<1x32xf32>
    %34 = vector.extract_strided_slice %30 {offsets = [0, 96], sizes = [1, 32], strides = [1, 1]} : vector<1x128xf32> to vector<1x32xf32>
    %35 = vector.extract_strided_slice %31 {offsets = [0, 64], sizes = [1, 32], strides = [1, 1]} : vector<1x128xf32> to vector<1x32xf32>
    %36 = arith.mulf %33, %19 : vector<1x32xf32>
    %37 = arith.mulf %32, %35 : vector<1x32xf32>
    %38 = arith.addf %36, %37 : vector<1x32xf32>
    %39 = math.tanh %38 : vector<1x32xf32>
    %40 = arith.mulf %34, %39 : vector<1x32xf32>
    %41 = tpu.concatenate %22, %40 in 0 : vector<1x32xf32>, vector<1x32xf32> -> vector<2x32xf32>
    %cst_11 = arith.constant dense<0.000000e+00> : vector<2x32xf32>
    %42 = tpu.matmul %41, %2, %cst_11 {dimension_numbers = #tpu.dot_dimension_numbers<[1], [0], [0], [1], [0, 0, 1, 1], [], []>} : vector<2x32xf32>, vector<32x32xf32>, vector<2x32xf32> -> vector<2x32xf32>
    %43 = vector.broadcast %4 : vector<1x32xf32> to vector<2x32xf32>
    %44 = arith.addf %42, %43 : vector<2x32xf32>
    %c0_12 = arith.constant 0 : index
    %c0_13 = arith.constant 0 : index
    %c0_14 = arith.constant 0 : index
    %45 = vector.load %arg3[%c0_12, %c0_13, %c0_14] : memref<1x2x32xf32, #tpu.memory_space<vmem>>, vector<1x2x32xf32>
    %46 = vector.shape_cast %45 : vector<1x2x32xf32> to vector<2x32xf32>
    %47 = vector.shape_cast %44 : vector<2x32xf32> to vector<1x2x32xf32>
    tpu.vector_store %arg3[%c0_12, %c0_13, %c0_14], %47 {strides = array<i32>} : memref<1x2x32xf32, #tpu.memory_space<vmem>>, vector<1x2x32xf32>,
    return
  }
  func.func @transform_0(%arg0: i32) -> (i32, i32, i32) {
    %c0_i32 = arith.constant 0 : i32
    %c0_i32_0 = arith.constant 0 : i32
    %c0_i32_1 = arith.constant 0 : i32
    return %arg0, %c0_i32, %c0_i32_0 : i32, i32, i32
  }
  func.func @transform_1(%arg0: i32) -> (i32, i32) {
    %c0_i32 = arith.constant 0 : i32
    %c0_i32_0 = arith.constant 0 : i32
    %c0_i32_1 = arith.constant 0 : i32
    return %c0_i32, %c0_i32_0 : i32, i32
  }
  func.func @transform_2(%arg0: i32) -> (i32, i32, i32) {
    %c0_i32 = arith.constant 0 : i32
    %c0_i32_0 = arith.constant 0 : i32
    %c0_i32_1 = arith.constant 0 : i32
    return %arg0, %c0_i32, %c0_i32_0 : i32, i32, i32
  }
}

</mosaic_0001>

<bundles_post_ra>
// kernel: tpu_custom_call.1
= control target key start
LH: loop header
LB: loop body
LE: loop exit
PB: predicated region body
PF: predicated region fallthrough
CT: control target
= control target key end

     0   :  { %7 = vsyncpa [#allocation3], 0  ;;  %s565_s0 = inlined_call_operand.hbm [shape: f32[1,2,32], index: 0, kind: input, shape index: {}]   ;;  %s566_s1 = inlined_call_operand.hbm [shape: f32[104,128], index: 1, kind: input, shape index: {}]   ;;  %s567_s2 = inlined_call_operand.hbm [shape: f32[1,2,32], index: 2, kind: output, shape index: {}]  }
   0x1   :  { %8 = vsyncpa [#allocation6], 0 }
   0x2   :  { %9 = vsyncpa [#allocation4], 0  ;;  %s503_s9 = smov [#allocation2]   ;;  %s504_s11 = smov [#allocation5]  }
   0x3   :  { %s16_s10 = sshll.u32 %s503_s9, 4  ;;  %s25_s12 = sshll.u32 %s504_s11, 4  ;;  %s17_s10 = int_to_ptr.vmem [resolvable:$true] %s16_s10  ;;  %s26_s12 = int_to_ptr.vmem [resolvable:$true] %s25_s12 }
   0x4   :  { %s445_s13 = scalar_lea.vmem %s17_s10, 32  ;;  %p450_p1 = scmp.lt.s32.totalorder %s17_s10, %s17_s10 }
   0x5   :  { %p446_p0 = scmp.ne.s32.totalorder %s17_s10, %s445_s13  ;;  %p451_p2 = scmp.lt.s32.totalorder %s445_s13, %s445_s13 }
   0x7   :  { %p452_p3 = por %p451_p2, %p450_p1 }
   0x9   :  { %p453_p4 = pnand %p452_p3, %p446_p0 }
   0xb   :  { %456 = shalt.err (!%p453_p4)
}
   0xc   :  { %19 = dma.hbm_to_vmem [thread:$0]  %s565_s0, 32, %s17_s10, [#allocation3]  }
   0xd   :  { %s465_s16 = scalar_lea.vmem %s26_s12, 1664  ;;  %p470_p6 = scmp.lt.s32.totalorder %s26_s12, %s26_s12 }
   0xe   :  { %p466_p5 = scmp.ne.s32.totalorder %s26_s12, %s465_s16  ;;  %p471_p7 = scmp.lt.s32.totalorder %s465_s16, %s465_s16 }
  0x10   :  { %p472_p8 = por %p471_p7, %p470_p6 }
  0x12   :  { %p473_p9 = pnand %p472_p8, %p466_p5 }
  0x14   :  { %476 = shalt.err (!%p473_p9)
}
  0x15   :  { %s505_s17 = smov 128   ;;  %s506_s18 = smov 8  }
  0x16   :  { %31 = dma.hbm_to_vmem [thread:$0]  %s566_s1, 1664, %s26_s12, [#allocation6], %s505_s17, %s505_s17, %s506_s18  }
  0x17   :  { %497 = dma.done.wait [#allocation3], 32  }
  0x18   :  { %498 = vsyncadd [#allocation3], 4294967264 }
  0x19   :  { %499 = dma.done.wait [#allocation6], 1664  }
  0x1a   :  { %500 = vsyncadd [#allocation6], 4294965632  ;;  %v507_v0 = vmov 0.0   ;;  %vm508_vm0 = vmmov 0   ;;  %v41_v1 = vld [vmem:[#allocation5 + $0x18] sm:$0xff]  ;;  %v40_v2 = vld [vmem:[#allocation5 + $0x10] sm:$0xff] }
  0x1b   :  { %378 = vmatprep.subr.mxu0 %v507_v0  ;;  %386 = vmatprep.mubr.msk.f32.mxu0 %vm508_vm0, %v507_v0  ;;  %v39_v3 = vld [vmem:[#allocation5 + $0x8] sm:$0xff]  ;;  %v38_v4 = vld [vmem:[#allocation5] sm:$0xff]  ;;  %v52_v5 = vld [vmem:[#allocation2] sm:$0x3]  ;;  %vm57_vm1 = vcmask 261120   ;;  %s509_s0 = smov 64  }
  0x1c   :  { %389 = vmatprep.subr.mxu1 %v507_v0  ;;  %397 = vmatprep.mubr.msk.f32.mxu1 %vm508_vm0, %v507_v0  ;;  %v356_v6 = vld [vmem:[#allocation5 + $0x60] ss:$0 sm:$0xff]  ;;  %v45_v17 = vld [vmem:[#allocation5 + $0x38] sm:$0xff]  ;;  %v44_v18 = vld [vmem:[#allocation5 + $0x30] sm:$0xff]  ;;  %s510_s1 = smov 96   ;;  %s511_s21 = smov 32  }
  0x1d   :  { %379 = vmatpush3.msra.mxu0 %v41_v1  ;;  %390 = vmatpush3.msra.mxu1 %v45_v17  ;;  %v43_v19 = vld [vmem:[#allocation5 + $0x28] sm:$0xff]  ;;  %v42_v20 = vld [vmem:[#allocation5 + $0x20] sm:$0xff]  ;;  %v49_v41 = vld [vmem:[#allocation5 + $0x58] sm:$0xff]  ;;  %vm257_vm2 = vcmask 1040384   ;;  %s512_s22 = smov [#allocation7]   ;;  %vm338_vm3 = vcmask 254976  }
  0x1e   :  { %380 = vmatprep.subr.mxu0 %v507_v0  ;;  %391 = vmatprep.subr.mxu1 %v507_v0  ;;  %v48_v42 = vld [vmem:[#allocation5 + $0x50] sm:$0xff]  ;;  %v47_v43 = vld [vmem:[#allocation5 + $0x48] sm:$0xff]  ;;  %v46_v44 = vld [vmem:[#allocation5 + $0x40] sm:$0xff]  ;;  %s346_s23 = sshll.u32 %s512_s22, 4  ;;  %s347_s23 = int_to_ptr.vmem [resolvable:$true] %s346_s23 }
  0x1f   :  { %381 = vmatpush3.msra.mxu0 %v40_v2  ;;  %392 = vmatpush3.msra.mxu1 %v44_v18  ;;  %v361_v50 = vld [vmem:[#allocation5 + $0x61] ss:$0 sm:$0xff]  ;;  %s477_s24 = scalar_lea.vmem %s347_s23, 32  ;;  %p482_p11 = scmp.lt.s32.totalorder %s347_s23, %s347_s23 }
  0x20   :  { %382 = vmatprep.subr.mxu0 %v507_v0  ;;  %393 = vmatprep.subr.mxu1 %v507_v0  ;;  %p478_p10 = scmp.ne.s32.totalorder %s347_s23, %s477_s24  ;;  %p483_p12 = scmp.lt.s32.totalorder %s477_s24, %s477_s24 }
  0x21   :  { %383 = vmatpush3.msra.mxu0 %v39_v3  ;;  %394 = vmatpush3.msra.mxu1 %v43_v19 }
  0x22   :  { %384 = vmatprep.subr.mxu0 %v507_v0  ;;  %395 = vmatprep.subr.mxu1 %v507_v0  ;;  %p484_p13 = por %p483_p12, %p482_p11 }
  0x23   :  { %385 = vmatpush3.msra.mxu0 %v38_v4  ;;  %396 = vmatpush3.msra.mxu1 %v42_v20 }
  0x24   :  { %387 = vmatmul.mubr.msk.f32.vlgmr.msra.gmra.mxu0 %vm57_vm1, %v52_v5  ;;  %400 = vmatprep.subr.mxu0 %v507_v0  ;;  %p485_p0 = pnand %p484_p13, %p478_p10 }
  0x25   :  { %408 = vmatprep.mubr.msk.f32.mxu0 %vm508_vm0, %v507_v0  ;;  %401 = vmatpush3.msra.mxu0 %v49_v41 }
  0x26   :  { %402 = vmatprep.subr.mxu0 %v507_v0 }
  0x27   :  { %403 = vmatpush3.msra.mxu0 %v48_v42 }
  0x28   :  { %404 = vmatprep.subr.mxu0 %v507_v0 }
  0x29   :  { %405 = vmatpush3.msra.mxu0 %v47_v43 }
  0x2a   :  { %406 = vmatprep.subr.mxu0 %v507_v0 }
  0x2b   :  { %407 = vmatpush3.msra.mxu0 %v46_v44 }
  0xe4   :  { %v127_v7 = vpop.f32.mrf.mxu0 }
  0xe5   :  { %v128_v8 = vadd.f32 %v356_v6, %v127_v7 }
  0xe6   :  { %v388_v9 = vpop.f32.mrf.mxu0 }
  0xe7   :  { %421 = vtanh.f32 %v128_v8  ;;  %v358_v11 = vmul.f32 -1.442695, %v128_v8 }
  0xe9   :  { %423 = vpow2.f32 %v358_v11 }
  0xf4   :  { %v422_v10 = vpop.eup %421 }
  0xf5   :  { %139 = vrot.lane.b32.xlu0 %v422_v10, %s509_s0 }
  0xf6   :  { %v424_v12 = vpop.eup %423 }
  0xf7   :  { %v134_v13 = vadd.f32 1.0, %v424_v12 }
  0xf9   :  { %425 = vrcp.f32 %v134_v13 }
 0x106   :  { %v426_v14 = vpop.eup %425 }
 0x167   :  { %v140_v15 = vpop.permute.xlu0 %139 }
 0x168   :  { %v142_v16 = vmul.f32 %v426_v14, %v140_v15 }
 0x16a   :  { %427 = vtanh.f32 %v142_v16  ;;  %v236_v22 = vrot.slane %v142_v16, 7 }
 0x177   :  { %v428_v21 = vpop.eup %427 }
 0x178   :  { %145 = vrot.lane.b32.xlu0 %v428_v21, %s510_s1 }
 0x17c   :  { %237 = vrot.lane.b32.xlu0 %v236_v22, %s511_s21 }
 0x1ea   :  { %v146_v23 = vpop.permute.xlu0 %145 }
 0x1eb   :  { %v148_v24 = vmul.f32 %v426_v14, %v146_v23 }
 0x1ed   :  { %150 = vrot.lane.b32.xlu1 %v148_v24, %s511_s21 }
 0x1ee   :  { %v238_v37 = vpop.permute.xlu0 %237 }
 0x25f   :  { %v151_v25 = vpop.permute.xlu1 %150 }
 0x260   :  { %398 = vmatmul.mubr.msk.f32.vlgmr.msra.gmra.mxu1 %vm57_vm1, %v151_v25 }
 0x320   :  { %v220_v26 = vpop.f32.mrf.mxu1 }
 0x321   :  { %v225_v27 = vrot.slane %v220_v26, 7 }
 0x322   :  { %v399_v28 = vpop.f32.mrf.mxu1 }
 0x323   :  { %v227_v29 = vadd.f32 %v225_v27, %v128_v8 }
 0x325   :  { %429 = vtanh.f32 %v227_v29  ;;  %v360_v31 = vmul.f32 -1.442695, %v227_v29 }
 0x327   :  { %431 = vpow2.f32 %v360_v31 }
 0x332   :  { %v430_v30 = vpop.eup %429 }
 0x333   :  { %242 = vrot.lane.b32.xlu1 %v430_v30, %s509_s0 }
 0x334   :  { %v432_v32 = vpop.eup %431 }
 0x335   :  { %v231_v33 = vadd.f32 1.0, %v432_v32 }
 0x337   :  { %433 = vrcp.f32 %v231_v33 }
 0x344   :  { %v434_v34 = vpop.eup %433 }
 0x345   :  { %v240_v38 = vmul.f32 %v434_v34, %v238_v37 }
 0x3a5   :  { %v243_v35 = vpop.permute.xlu1 %242 }
 0x3a6   :  { %v245_v36 = vmul.f32 %v434_v34, %v243_v35 }
 0x3a8   :  { %247 = vrot.lane.b32.xlu1 %v245_v36, %s511_s21 }
 0x41a   :  { %v248_v39 = vpop.permute.xlu1 %247 }
 0x41b   :  { %v250_v40 = vadd.f32 %v248_v39, %v240_v38 }
 0x41d   :  { %435 = vtanh.f32 %v250_v40 }
 0x42a   :  { %v436_v45 = vpop.eup %435 }
 0x42b   :  { %253 = vrot.lane.b32.xlu0 %v436_v45, %s509_s0 }
 0x49d   :  { %v254_v46 = vpop.permute.xlu0 %253 }
 0x49e   :  { %v256_v47 = vmul.f32 %v434_v34, %v254_v46 }
 0x4a0   :  { %v258_v48 = vsel %vm257_vm2, %v148_v24, %v256_v47 }
 0x4a1   :  { %264 = vrot.lane.b32.xlu1 %v258_v48, %s511_s21 }
 0x513   :  { %v265_v49 = vpop.permute.xlu1 %264 }
 0x514   :  { %409 = vmatmul.mubr.msk.f32.vlgmr.msra.gmra.mxu0 %vm57_vm1, %v265_v49 }
 0x5d4   :  { %v334_v51 = vpop.f32.mrf.mxu0 }
 0x5d5   :  { %v335_v52 = vadd.f32 %v361_v50, %v334_v51 }
 0x5d6   :  { %v410_v53 = vpop.f32.mrf.mxu0 }
 0x5d7   :  { %339 = vst.msk [vmem:[#allocation7] sm:$0x3] %vm338_vm3, %v335_v52 }
 0x5d8   :  { %488 = shalt.err (!%p485_p0)
}
 0x5d9   :  { %349 = dma.vmem_to_hbm [thread:$0]  %s347_s23, 32, %s567_s2, [#allocation4]  }
 0x5da   :  { %501 = dma.done.wait [#allocation4], 32  }
 0x5db   :  { %502 = vsyncadd [#allocation4], 4294967264 }
 0x5dc   :  { %353 = vsyncpa [#allocation3], 1 }
 0x5dd   :  { %354 = vsyncpa [#allocation6], 1 }
 0x5de   :  { %355 = vsyncpa [#allocation4], 1 }

</bundles_post_ra>
